<compile_context>
chip_gen: v7x
topology: tpu7x:2x2x1
jax: 0.10.0
libtpu: 0.0.40
codegen_flags: <defaults>
</compile_context>

<pallas_src>
import functools
import math

import jax
import jax.numpy as jnp
from jax import lax
from jax.experimental import pallas as pl
from jax.experimental.pallas import tpu as pltpu

# ---- problem sizes (small, consistent with the module) ----
BATCH = 2
SEQ = 8
DIM = 32
HEADS = 4
HEAD_DIM = DIM // HEADS
EPS = 1e-5  # torch.nn.LayerNorm default


def _layernorm(x, w, b):
    mu = jnp.mean(x, axis=-1, keepdims=True)
    var = jnp.mean((x - mu) ** 2, axis=-1, keepdims=True)
    return (x - mu) * lax.rsqrt(var + EPS) * w + b


def transformer_block_kernel(x_ref, slab_ref, w2_ref, o_ref, attn_scratch, *, heads):
    rows, dim = x_ref.shape          # rows = batch * seq (batch folded by wrapper)
    head_dim = dim // heads
    hidden = w2_ref.shape[0]         # 4 * dim

    # ---- static views into the packed parameter slab (zero-cost) ----
    W0 = 3 * dim                     # end of wqkv columns
    W1 = 4 * dim                     # end of wo columns
    W2 = W1 + hidden                 # end of w1 columns
    r0 = dim                         # vector row 0
    r1 = dim + 1                     # vector row 1
    rm = dim + 2                     # first mask row

    wqkv = slab_ref[0:dim, 0:W0]             # (dim, 3*dim), scale folded into Q cols
    wo   = slab_ref[0:dim, W0:W1]            # (dim, dim)
    w1   = slab_ref[0:dim, W1:W2]            # (dim, hidden)
    ln1w = slab_ref[r0:r0 + 1, 0:dim]
    ln1b = slab_ref[r0:r0 + 1, dim:2 * dim]
    ln2w = slab_ref[r0:r0 + 1, 2 * dim:3 * dim]
    ln2b = slab_ref[r0:r0 + 1, 3 * dim:4 * dim]
    b1   = slab_ref[r0:r0 + 1, W1:W2]
    bo   = slab_ref[r1:r1 + 1, 0:dim]
    b2   = slab_ref[r1:r1 + 1, dim:2 * dim]
    mask_bias = slab_ref[rm:rm + rows, 0:rows]   # (rows, rows) additive 0 / -1e30

    x = x_ref[...]                   # (rows, dim)

    # ---------------- attention branch ----------------
    xn = _layernorm(x, ln1w, ln1b)
    qkv = jnp.dot(xn, wqkv, preferred_element_type=jnp.float32)   # (rows, 3*dim)
    q = qkv[:, :dim]
    k = qkv[:, dim:2 * dim]
    v = qkv[:, 2 * dim:3 * dim]
    kT = k.T                         # one transpose, hoisted out of the head loop

    for h in range(heads):           # static loop, HEADS is tiny
        sl = slice(h * head_dim, (h + 1) * head_dim)
        qh = q[:, sl]                # (rows, hd)
        kTh = kT[sl, :]              # (hd, rows), sublane-aligned slice
        vh = v[:, sl]                # (rows, hd)
        dots = jnp.dot(qh, kTh, preferred_element_type=jnp.float32)  # (rows, rows)
        dots = dots + mask_bias      # block-diagonal causal mask (additive)
        m = jnp.max(dots, axis=-1, keepdims=True)
        p = jnp.exp(dots - m)
        l = jnp.sum(p, axis=-1, keepdims=True)
        hout = jnp.dot(p, vh, preferred_element_type=jnp.float32)    # (rows, hd)
        # deferred softmax normalization: scale the small (rows, hd) tile
        attn_scratch[:, sl] = hout * pl.reciprocal(l, approx=False)

    # single merged W_o matmul over the concatenated head outputs
    attn_out = attn_scratch[...]
    x = x + jnp.dot(attn_out, wo, preferred_element_type=jnp.float32) + bo

    # ---------------- feed-forward branch ----------------
    xn2 = _layernorm(x, ln2w, ln2b)
    h1 = jnp.dot(xn2, w1, preferred_element_type=jnp.float32) + b1
    h1 = 0.5 * h1 * (1.0 + lax.erf(h1 * (1.0 / math.sqrt(2.0))))  # exact GELU
    h2 = jnp.dot(h1, w2_ref[...], preferred_element_type=jnp.float32) + b2
    o_ref[...] = x + h2


def pack_params(params, batch, seq):
    """One-time, offline packing of all parameters into two DMA-friendly slabs."""
    dim = DIM
    hidden = 4 * dim
    rows = batch * seq
    scale = dim ** (-0.5)
    # Fused QKV weight with the attention scale (full dim, as in the module)
    # pre-folded into the Q columns.
    wqkv = jnp.concatenate(
        [params["wq_t"] * scale, params["wk_t"], params["wv_t"]], axis=1)  # (dim, 3*dim)

    slab = jnp.zeros((dim + 2 + rows, 4 * dim + hidden), jnp.float32)      # (50, 256)
    slab = slab.at[0:dim, 0:3 * dim].set(wqkv)
    slab = slab.at[0:dim, 3 * dim:4 * dim].set(params["wo_t"])
    slab = slab.at[0:dim, 4 * dim:4 * dim + hidden].set(params["w1_t"])
    slab = slab.at[dim, 0:dim].set(params["ln1_w"][0])
    slab = slab.at[dim, dim:2 * dim].set(params["ln1_b"][0])
    slab = slab.at[dim, 2 * dim:3 * dim].set(params["ln2_w"][0])
    slab = slab.at[dim, 3 * dim:4 * dim].set(params["ln2_b"][0])
    slab = slab.at[dim, 4 * dim:4 * dim + hidden].set(params["b1"][0])
    slab = slab.at[dim + 1, 0:dim].set(params["bo"][0])
    slab = slab.at[dim + 1, dim:2 * dim].set(params["b2"][0])

    # Block-diagonal causal mask over the folded (batch*seq) row axis, as an
    # additive bias (0 visible / -1e30 masked; diagonal always visible -> no NaNs).
    r = jnp.arange(rows)
    visible = (r[:, None] // seq == r[None, :] // seq) & (r[None, :] <= r[:, None])
    mask_bias = jnp.where(visible, 0.0, -1e30).astype(jnp.float32)
    slab = slab.at[dim + 2:dim + 2 + rows, 0:rows].set(mask_bias)

    return {"slab": slab, "w2_t": params["w2_t"]}


def transformer_block(x, packed, tgt_mask=None):
    # tgt_mask accepted for API parity; the PyTorch module never uses it.
    b, s, d = x.shape
    rows = b * s
    x2 = x.reshape(rows, d)          # fold batch into rows: one invocation, no grid
    out = pl.pallas_call(
        functools.partial(transformer_block_kernel, heads=HEADS),
        out_shape=jax.ShapeDtypeStruct((rows, d), x.dtype),
        scratch_shapes=[pltpu.VMEM((rows, d), jnp.float32)],
    )(x2, packed["slab"], packed["w2_t"])
    # Output stays (rows, 32): only 2 vregs, a lane-dense relayout would cost more
    # than the few masked stores it saves (per review).
    return out.reshape(b, s, d)


def init_params(key):
    ks = jax.random.split(key, 12)
    n = lambda k, shape, scale=0.05: (scale * jax.random.normal(k, shape)).astype(jnp.float32)
    # PyTorch Linear weights are (out, in); store transposed (in, out).
    wq = n(ks[0], (DIM, DIM))
    wkv = n(ks[1], (2 * DIM, DIM))
    wo = n(ks[2], (DIM, DIM))
    w1 = n(ks[3], (4 * DIM, DIM))
    w2 = n(ks[4], (DIM, 4 * DIM))
    params = dict(
        ln1_w=1.0 + n(ks[5], (1, DIM)),
        ln1_b=n(ks[6], (1, DIM)),
        ln2_w=1.0 + n(ks[7], (1, DIM)),
        ln2_b=n(ks[8], (1, DIM)),
        wq_t=wq.T,
        wk_t=wkv[:DIM].T,   # rows 0:dim of to_kv weight -> K
        wv_t=wkv[DIM:].T,   # rows dim:2*dim -> V
        wo_t=wo.T,
        bo=n(ks[9], (1, DIM)),
        w1_t=w1.T,
        b1=n(ks[10], (1, 4 * DIM)),
        w2_t=w2.T,
        b2=n(ks[11], (1, DIM)),
    )
    return params


def reference(x, p):
    def ln(t, w, b):
        mu = t.mean(-1, keepdims=True)
        var = ((t - mu) ** 2).mean(-1, keepdims=True)
        return (t - mu) / jnp.sqrt(var + EPS) * w + b

    b_, s_, d_ = x.shape
    xn = ln(x, p["ln1_w"], p["ln1_b"])
    q, k, v = xn @ p["wq_t"], xn @ p["wk_t"], xn @ p["wv_t"]
    split = lambda t: t.reshape(b_, s_, HEADS, HEAD_DIM).transpose(0, 2, 1, 3)
    qh, kh, vh = split(q), split(k), split(v)
    dots = jnp.einsum("bhqd,bhkd->bhqk", qh, kh) * (DIM ** -0.5)
    mask = jnp.tril(jnp.ones((s_, s_), dtype=bool))
    dots = jnp.where(mask[None, None], dots, -jnp.inf)
    attn = jax.nn.softmax(dots, axis=-1)
    out = jnp.einsum("bhqk,bhkd->bhqd", attn, vh)
    out = out.transpose(0, 2, 1, 3).reshape(b_, s_, d_)
    out = out @ p["wo_t"] + p["bo"]
    x = x + out
    xn2 = ln(x, p["ln2_w"], p["ln2_b"])
    h1 = jax.nn.gelu(xn2 @ p["w1_t"] + p["b1"], approximate=False)
    return x + (h1 @ p["w2_t"] + p["b2"])


if __name__ == "__main__":
    key = jax.random.PRNGKey(0)
    kx, kp = jax.random.split(key)
    x = jax.random.normal(kx, (BATCH, SEQ, DIM), dtype=jnp.float32)
    params = init_params(kp)
    packed = jax.block_until_ready(pack_params(params, BATCH, SEQ))  # one-time, off the hot path
    tgt_mask = None  # unused by the module's forward

    fwd = jax.jit(transformer_block)
    out = fwd(x, packed, tgt_mask)
    out = jax.block_until_ready(out)

    ref = reference(x, params)
    assert out.shape == (BATCH, SEQ, DIM)
    assert jnp.allclose(out, ref, atol=1e-4, rtol=1e-4), (
        float(jnp.max(jnp.abs(out - ref))))
    print("KERNEL_OK")
</pallas_src>

<mosaic_0001>
module attributes {stable_mosaic.version = 11 : i64} {
  func.func @transformer_block_kernel(%arg0: memref<16x32xf32, #tpu.memory_space<vmem>>, %arg1: memref<50x256xf32, #tpu.memory_space<vmem>>, %arg2: memref<128x32xf32, #tpu.memory_space<vmem>>, %arg3: memref<16x32xf32, #tpu.memory_space<vmem>>, %arg4: memref<16x32xf32, #tpu.memory_space<vmem>>) attributes {dimension_semantics = [], scalar_prefetch = 0 : i64, scratch_operands = 1 : i64, tpu.core_type = #tpu.core_type<tc>} {
    %c0 = arith.constant 0 : index
    %c0_0 = arith.constant 0 : index
    %0 = vector.load %arg1[%c0, %c0_0] : memref<50x256xf32, #tpu.memory_space<vmem>>, vector<32x96xf32>
    %c0_1 = arith.constant 0 : index
    %c96 = arith.constant 96 : index
    %1 = vector.load %arg1[%c0_1, %c96] : memref<50x256xf32, #tpu.memory_space<vmem>>, vector<32x32xf32>
    %c0_2 = arith.constant 0 : index
    %c128 = arith.constant 128 : index
    %2 = vector.load %arg1[%c0_2, %c128] : memref<50x256xf32, #tpu.memory_space<vmem>>, vector<32x128xf32>
    %c32 = arith.constant 32 : index
    %c0_3 = arith.constant 0 : index
    %3 = vector.load %arg1[%c32, %c0_3] : memref<50x256xf32, #tpu.memory_space<vmem>>, vector<1x32xf32>
    %c32_4 = arith.constant 32 : index
    %c32_5 = arith.constant 32 : index
    %4 = vector.load %arg1[%c32_4, %c32_5] : memref<50x256xf32, #tpu.memory_space<vmem>>, vector<1x32xf32>
    %c32_6 = arith.constant 32 : index
    %c64 = arith.constant 64 : index
    %5 = vector.load %arg1[%c32_6, %c64] : memref<50x256xf32, #tpu.memory_space<vmem>>, vector<1x32xf32>
    %c32_7 = arith.constant 32 : index
    %c96_8 = arith.constant 96 : index
    %6 = vector.load %arg1[%c32_7, %c96_8] : memref<50x256xf32, #tpu.memory_space<vmem>>, vector<1x32xf32>
    %c32_9 = arith.constant 32 : index
    %c128_10 = arith.constant 128 : index
    %7 = vector.load %arg1[%c32_9, %c128_10] : memref<50x256xf32, #tpu.memory_space<vmem>>, vector<1x128xf32>
    %c33 = arith.constant 33 : index
    %c0_11 = arith.constant 0 : index
    %8 = vector.load %arg1[%c33, %c0_11] : memref<50x256xf32, #tpu.memory_space<vmem>>, vector<1x32xf32>
    %c33_12 = arith.constant 33 : index
    %c32_13 = arith.constant 32 : index
    %9 = vector.load %arg1[%c33_12, %c32_13] : memref<50x256xf32, #tpu.memory_space<vmem>>, vector<1x32xf32>
    %c34 = arith.constant 34 : index
    %c0_14 = arith.constant 0 : index
    %10 = vector.load %arg1[%c34, %c0_14] : memref<50x256xf32, #tpu.memory_space<vmem>>, vector<16x16xf32>
    %c0_15 = arith.constant 0 : index
    %c0_16 = arith.constant 0 : index
    %11 = vector.load %arg0[%c0_15, %c0_16] : memref<16x32xf32, #tpu.memory_space<vmem>>, vector<16x32xf32>
    %cst = arith.constant dense<0.000000e+00> : vector<16xf32>
    %12 = vector.multi_reduction <add>, %11, %cst [1] : vector<16x32xf32> to vector<16xf32>
    %13 = vector.shape_cast %12 : vector<16xf32> to vector<16x1xf32>
    %cst_17 = arith.constant 3.200000e+01 : f32
    %14 = vector.broadcast %cst_17 : f32 to vector<16x1xf32>
    %15 = arith.divf %13, %14 : vector<16x1xf32>
    %16 = vector.broadcast %15 : vector<16x1xf32> to vector<16x32xf32>
    %17 = arith.subf %11, %16 : vector<16x32xf32>
    %18 = arith.mulf %17, %17 : vector<16x32xf32>
    %cst_18 = arith.constant dense<0.000000e+00> : vector<16xf32>
    %19 = vector.multi_reduction <add>, %18, %cst_18 [1] : vector<16x32xf32> to vector<16xf32>
    %20 = vector.shape_cast %19 : vector<16xf32> to vector<16x1xf32>
    %cst_19 = arith.constant 3.200000e+01 : f32
    %21 = vector.broadcast %cst_19 : f32 to vector<16x1xf32>
    %22 = arith.divf %20, %21 : vector<16x1xf32>
    %23 = vector.broadcast %15 : vector<16x1xf32> to vector<16x32xf32>
    %24 = arith.subf %11, %23 : vector<16x32xf32>
    %cst_20 = arith.constant 9.99999974E-6 : f32
    %25 = vector.broadcast %cst_20 : f32 to vector<16x1xf32>
    %26 = arith.addf %22, %25 : vector<16x1xf32>
    %27 = math.rsqrt %26 : vector<16x1xf32>
    %28 = vector.broadcast %27 : vector<16x1xf32> to vector<16x32xf32>
    %29 = arith.mulf %24, %28 : vector<16x32xf32>
    %30 = vector.broadcast %3 : vector<1x32xf32> to vector<16x32xf32>
    %31 = arith.mulf %29, %30 : vector<16x32xf32>
    %32 = vector.broadcast %4 : vector<1x32xf32> to vector<16x32xf32>
    %33 = arith.addf %31, %32 : vector<16x32xf32>
    %cst_21 = arith.constant dense<0.000000e+00> : vector<16x96xf32>
    %34 = tpu.matmul %33, %0, %cst_21 {dimension_numbers = #tpu.dot_dimension_numbers<[1], [0], [0], [1], [0, 0, 1, 1], [], []>} : vector<16x32xf32>, vector<32x96xf32>, vector<16x96xf32> -> vector<16x96xf32>
    %35 = vector.extract_strided_slice %34 {offsets = [0, 0], sizes = [16, 32], strides = [1, 1]} : vector<16x96xf32> to vector<16x32xf32>
    %36 = vector.extract_strided_slice %34 {offsets = [0, 32], sizes = [16, 32], strides = [1, 1]} : vector<16x96xf32> to vector<16x32xf32>
    %37 = vector.extract_strided_slice %34 {offsets = [0, 64], sizes = [16, 32], strides = [1, 1]} : vector<16x96xf32> to vector<16x32xf32>
    %38 = tpu.transpose %36, [1, 0] : vector<16x32xf32> -> vector<32x16xf32>
    %39 = vector.extract_strided_slice %35 {offsets = [0, 0], sizes = [16, 8], strides = [1, 1]} : vector<16x32xf32> to vector<16x8xf32>
    %40 = vector.extract_strided_slice %38 {offsets = [0, 0], sizes = [8, 16], strides = [1, 1]} : vector<32x16xf32> to vector<8x16xf32>
    %41 = vector.extract_strided_slice %37 {offsets = [0, 0], sizes = [16, 8], strides = [1, 1]} : vector<16x32xf32> to vector<16x8xf32>
    %cst_22 = arith.constant dense<0.000000e+00> : vector<16x16xf32>
    %42 = tpu.matmul %39, %40, %cst_22 {dimension_numbers = #tpu.dot_dimension_numbers<[1], [0], [0], [1], [0, 0, 1, 1], [], []>} : vector<16x8xf32>, vector<8x16xf32>, vector<16x16xf32> -> vector<16x16xf32>
    %43 = arith.addf %42, %10 : vector<16x16xf32>
    %cst_23 = arith.constant dense<0xFF800000> : vector<16xf32>
    %44 = vector.multi_reduction <maximumf>, %43, %cst_23 [1] : vector<16x16xf32> to vector<16xf32>
    %45 = vector.shape_cast %44 : vector<16xf32> to vector<16x1xf32>
    %46 = vector.broadcast %45 : vector<16x1xf32> to vector<16x16xf32>
    %47 = arith.subf %43, %46 : vector<16x16xf32>
    %48 = math.exp %47 : vector<16x16xf32>
    %cst_24 = arith.constant dense<0.000000e+00> : vector<16xf32>
    %49 = vector.multi_reduction <add>, %48, %cst_24 [1] : vector<16x16xf32> to vector<16xf32>
    %50 = vector.shape_cast %49 : vector<16xf32> to vector<16x1xf32>
    %cst_25 = arith.constant dense<0.000000e+00> : vector<16x8xf32>
    %51 = tpu.matmul %48, %41, %cst_25 {dimension_numbers = #tpu.dot_dimension_numbers<[1], [0], [0], [1], [0, 0, 1, 1], [], []>} : vector<16x16xf32>, vector<16x8xf32>, vector<16x8xf32> -> vector<16x8xf32>
    %52 = tpu.reciprocal %50 : vector<16x1xf32> -> vector<16x1xf32>
    %53 = vector.broadcast %52 : vector<16x1xf32> to vector<16x8xf32>
    %54 = arith.mulf %51, %53 : vector<16x8xf32>
    %c0_26 = arith.constant 0 : index
    %c0_27 = arith.constant 0 : index
    %55 = vector.load %arg4[%c0_26, %c0_27] : memref<16x32xf32, #tpu.memory_space<vmem>>, vector<16x8xf32>
    tpu.vector_store %arg4[%c0_26, %c0_27], %54 {strides = array<i32>} : memref<16x32xf32, #tpu.memory_space<vmem>>, vector<16x8xf32>,
    %56 = vector.extract_strided_slice %35 {offsets = [0, 8], sizes = [16, 8], strides = [1, 1]} : vector<16x32xf32> to vector<16x8xf32>
    %57 = vector.extract_strided_slice %38 {offsets = [8, 0], sizes = [8, 16], strides = [1, 1]} : vector<32x16xf32> to vector<8x16xf32>
    %58 = vector.extract_strided_slice %37 {offsets = [0, 8], sizes = [16, 8], strides = [1, 1]} : vector<16x32xf32> to vector<16x8xf32>
    %cst_28 = arith.constant dense<0.000000e+00> : vector<16x16xf32>
    %59 = tpu.matmul %56, %57, %cst_28 {dimension_numbers = #tpu.dot_dimension_numbers<[1], [0], [0], [1], [0, 0, 1, 1], [], []>} : vector<16x8xf32>, vector<8x16xf32>, vector<16x16xf32> -> vector<16x16xf32>
    %60 = arith.addf %59, %10 : vector<16x16xf32>
    %cst_29 = arith.constant dense<0xFF800000> : vector<16xf32>
    %61 = vector.multi_reduction <maximumf>, %60, %cst_29 [1] : vector<16x16xf32> to vector<16xf32>
    %62 = vector.shape_cast %61 : vector<16xf32> to vector<16x1xf32>
    %63 = vector.broadcast %62 : vector<16x1xf32> to vector<16x16xf32>
    %64 = arith.subf %60, %63 : vector<16x16xf32>
    %65 = math.exp %64 : vector<16x16xf32>
    %cst_30 = arith.constant dense<0.000000e+00> : vector<16xf32>
    %66 = vector.multi_reduction <add>, %65, %cst_30 [1] : vector<16x16xf32> to vector<16xf32>
    %67 = vector.shape_cast %66 : vector<16xf32> to vector<16x1xf32>
    %cst_31 = arith.constant dense<0.000000e+00> : vector<16x8xf32>
    %68 = tpu.matmul %65, %58, %cst_31 {dimension_numbers = #tpu.dot_dimension_numbers<[1], [0], [0], [1], [0, 0, 1, 1], [], []>} : vector<16x16xf32>, vector<16x8xf32>, vector<16x8xf32> -> vector<16x8xf32>
    %69 = tpu.reciprocal %67 : vector<16x1xf32> -> vector<16x1xf32>
    %70 = vector.broadcast %69 : vector<16x1xf32> to vector<16x8xf32>
    %71 = arith.mulf %68, %70 : vector<16x8xf32>
    %c0_32 = arith.constant 0 : index
    %c8 = arith.constant 8 : index
    %72 = vector.load %arg4[%c0_32, %c8] : memref<16x32xf32, #tpu.memory_space<vmem>>, vector<16x8xf32>
    tpu.vector_store %arg4[%c0_32, %c8], %71 {strides = array<i32>} : memref<16x32xf32, #tpu.memory_space<vmem>>, vector<16x8xf32>,
    %73 = vector.extract_strided_slice %35 {offsets = [0, 16], sizes = [16, 8], strides = [1, 1]} : vector<16x32xf32> to vector<16x8xf32>
    %74 = vector.extract_strided_slice %38 {offsets = [16, 0], sizes = [8, 16], strides = [1, 1]} : vector<32x16xf32> to vector<8x16xf32>
    %75 = vector.extract_strided_slice %37 {offsets = [0, 16], sizes = [16, 8], strides = [1, 1]} : vector<16x32xf32> to vector<16x8xf32>
    %cst_33 = arith.constant dense<0.000000e+00> : vector<16x16xf32>
    %76 = tpu.matmul %73, %74, %cst_33 {dimension_numbers = #tpu.dot_dimension_numbers<[1], [0], [0], [1], [0, 0, 1, 1], [], []>} : vector<16x8xf32>, vector<8x16xf32>, vector<16x16xf32> -> vector<16x16xf32>
    %77 = arith.addf %76, %10 : vector<16x16xf32>
    %cst_34 = arith.constant dense<0xFF800000> : vector<16xf32>
    %78 = vector.multi_reduction <maximumf>, %77, %cst_34 [1] : vector<16x16xf32> to vector<16xf32>
    %79 = vector.shape_cast %78 : vector<16xf32> to vector<16x1xf32>
    %80 = vector.broadcast %79 : vector<16x1xf32> to vector<16x16xf32>
    %81 = arith.subf %77, %80 : vector<16x16xf32>
    %82 = math.exp %81 : vector<16x16xf32>
    %cst_35 = arith.constant dense<0.000000e+00> : vector<16xf32>
    %83 = vector.multi_reduction <add>, %82, %cst_35 [1] : vector<16x16xf32> to vector<16xf32>
    %84 = vector.shape_cast %83 : vector<16xf32> to vector<16x1xf32>
    %cst_36 = arith.constant dense<0.000000e+00> : vector<16x8xf32>
    %85 = tpu.matmul %82, %75, %cst_36 {dimension_numbers = #tpu.dot_dimension_numbers<[1], [0], [0], [1], [0, 0, 1, 1], [], []>} : vector<16x16xf32>, vector<16x8xf32>, vector<16x8xf32> -> vector<16x8xf32>
    %86 = tpu.reciprocal %84 : vector<16x1xf32> -> vector<16x1xf32>
    %87 = vector.broadcast %86 : vector<16x1xf32> to vector<16x8xf32>
    %88 = arith.mulf %85, %87 : vector<16x8xf32>
    %c0_37 = arith.constant 0 : index
    %c16 = arith.constant 16 : index
    %89 = vector.load %arg4[%c0_37, %c16] : memref<16x32xf32, #tpu.memory_space<vmem>>, vector<16x8xf32>
    tpu.vector_store %arg4[%c0_37, %c16], %88 {strides = array<i32>} : memref<16x32xf32, #tpu.memory_space<vmem>>, vector<16x8xf32>,
    %90 = vector.extract_strided_slice %35 {offsets = [0, 24], sizes = [16, 8], strides = [1, 1]} : vector<16x32xf32> to vector<16x8xf32>
    %91 = vector.extract_strided_slice %38 {offsets = [24, 0], sizes = [8, 16], strides = [1, 1]} : vector<32x16xf32> to vector<8x16xf32>
    %92 = vector.extract_strided_slice %37 {offsets = [0, 24], sizes = [16, 8], strides = [1, 1]} : vector<16x32xf32> to vector<16x8xf32>
    %cst_38 = arith.constant dense<0.000000e+00> : vector<16x16xf32>
    %93 = tpu.matmul %90, %91, %cst_38 {dimension_numbers = #tpu.dot_dimension_numbers<[1], [0], [0], [1], [0, 0, 1, 1], [], []>} : vector<16x8xf32>, vector<8x16xf32>, vector<16x16xf32> -> vector<16x16xf32>
    %94 = arith.addf %93, %10 : vector<16x16xf32>
    %cst_39 = arith.constant dense<0xFF800000> : vector<16xf32>
    %95 = vector.multi_reduction <maximumf>, %94, %cst_39 [1] : vector<16x16xf32> to vector<16xf32>
    %96 = vector.shape_cast %95 : vector<16xf32> to vector<16x1xf32>
    %97 = vector.broadcast %96 : vector<16x1xf32> to vector<16x16xf32>
    %98 = arith.subf %94, %97 : vector<16x16xf32>
    %99 = math.exp %98 : vector<16x16xf32>
    %cst_40 = arith.constant dense<0.000000e+00> : vector<16xf32>
    %100 = vector.multi_reduction <add>, %99, %cst_40 [1] : vector<16x16xf32> to vector<16xf32>
    %101 = vector.shape_cast %100 : vector<16xf32> to vector<16x1xf32>
    %cst_41 = arith.constant dense<0.000000e+00> : vector<16x8xf32>
    %102 = tpu.matmul %99, %92, %cst_41 {dimension_numbers = #tpu.dot_dimension_numbers<[1], [0], [0], [1], [0, 0, 1, 1], [], []>} : vector<16x16xf32>, vector<16x8xf32>, vector<16x8xf32> -> vector<16x8xf32>
    %103 = tpu.reciprocal %101 : vector<16x1xf32> -> vector<16x1xf32>
    %104 = vector.broadcast %103 : vector<16x1xf32> to vector<16x8xf32>
    %105 = arith.mulf %102, %104 : vector<16x8xf32>
    %c0_42 = arith.constant 0 : index
    %c24 = arith.constant 24 : index
    %106 = vector.load %arg4[%c0_42, %c24] : memref<16x32xf32, #tpu.memory_space<vmem>>, vector<16x8xf32>
    tpu.vector_store %arg4[%c0_42, %c24], %105 {strides = array<i32>} : memref<16x32xf32, #tpu.memory_space<vmem>>, vector<16x8xf32>,
    %c0_43 = arith.constant 0 : index
    %c0_44 = arith.constant 0 : index
    %107 = vector.load %arg4[%c0_43, %c0_44] : memref<16x32xf32, #tpu.memory_space<vmem>>, vector<16x32xf32>
    %cst_45 = arith.constant dense<0.000000e+00> : vector<16x32xf32>
    %108 = tpu.matmul %107, %1, %cst_45 {dimension_numbers = #tpu.dot_dimension_numbers<[1], [0], [0], [1], [0, 0, 1, 1], [], []>} : vector<16x32xf32>, vector<32x32xf32>, vector<16x32xf32> -> vector<16x32xf32>
    %109 = arith.addf %11, %108 : vector<16x32xf32>
    %110 = vector.broadcast %8 : vector<1x32xf32> to vector<16x32xf32>
    %111 = arith.addf %109, %110 : vector<16x32xf32>
    %cst_46 = arith.constant dense<0.000000e+00> : vector<16xf32>
    %112 = vector.multi_reduction <add>, %111, %cst_46 [1] : vector<16x32xf32> to vector<16xf32>
    %113 = vector.shape_cast %112 : vector<16xf32> to vector<16x1xf32>
    %cst_47 = arith.constant 3.200000e+01 : f32
    %114 = vector.broadcast %cst_47 : f32 to vector<16x1xf32>
    %115 = arith.divf %113, %114 : vector<16x1xf32>
    %116 = vector.broadcast %115 : vector<16x1xf32> to vector<16x32xf32>
    %117 = arith.subf %111, %116 : vector<16x32xf32>
    %118 = arith.mulf %117, %117 : vector<16x32xf32>
    %cst_48 = arith.constant dense<0.000000e+00> : vector<16xf32>
    %119 = vector.multi_reduction <add>, %118, %cst_48 [1] : vector<16x32xf32> to vector<16xf32>
    %120 = vector.shape_cast %119 : vector<16xf32> to vector<16x1xf32>
    %cst_49 = arith.constant 3.200000e+01 : f32
    %121 = vector.broadcast %cst_49 : f32 to vector<16x1xf32>
    %122 = arith.divf %120, %121 : vector<16x1xf32>
    %123 = vector.broadcast %115 : vector<16x1xf32> to vector<16x32xf32>
    %124 = arith.subf %111, %123 : vector<16x32xf32>
    %cst_50 = arith.constant 9.99999974E-6 : f32
    %125 = vector.broadcast %cst_50 : f32 to vector<16x1xf32>
    %126 = arith.addf %122, %125 : vector<16x1xf32>
    %127 = math.rsqrt %126 : vector<16x1xf32>
    %128 = vector.broadcast %127 : vector<16x1xf32> to vector<16x32xf32>
    %129 = arith.mulf %124, %128 : vector<16x32xf32>
    %130 = vector.broadcast %5 : vector<1x32xf32> to vector<16x32xf32>
    %131 = arith.mulf %129, %130 : vector<16x32xf32>
    %132 = vector.broadcast %6 : vector<1x32xf32> to vector<16x32xf32>
    %133 = arith.addf %131, %132 : vector<16x32xf32>
    %cst_51 = arith.constant dense<0.000000e+00> : vector<16x128xf32>
    %134 = tpu.matmul %133, %2, %cst_51 {dimension_numbers = #tpu.dot_dimension_numbers<[1], [0], [0], [1], [0, 0, 1, 1], [], []>} : vector<16x32xf32>, vector<32x128xf32>, vector<16x128xf32> -> vector<16x128xf32>
    %135 = vector.broadcast %7 : vector<1x128xf32> to vector<16x128xf32>
    %136 = arith.addf %134, %135 : vector<16x128xf32>
    %cst_52 = arith.constant 5.000000e-01 : f32
    %137 = vector.broadcast %cst_52 : f32 to vector<16x128xf32>
    %138 = arith.mulf %137, %136 : vector<16x128xf32>
    %cst_53 = arith.constant 0.707106769 : f32
    %139 = vector.broadcast %cst_53 : f32 to vector<16x128xf32>
    %140 = arith.mulf %136, %139 : vector<16x128xf32>
    %141 = math.erf %140 : vector<16x128xf32>
    %cst_54 = arith.constant 1.000000e+00 : f32
    %142 = vector.broadcast %cst_54 : f32 to vector<16x128xf32>
    %143 = arith.addf %142, %141 : vector<16x128xf32>
    %144 = arith.mulf %138, %143 : vector<16x128xf32>
    %c0_55 = arith.constant 0 : index
    %c0_56 = arith.constant 0 : index
    %145 = vector.load %arg2[%c0_55, %c0_56] : memref<128x32xf32, #tpu.memory_space<vmem>>, vector<128x32xf32>
    %cst_57 = arith.constant dense<0.000000e+00> : vector<16x32xf32>
    %146 = tpu.matmul %144, %145, %cst_57 {dimension_numbers = #tpu.dot_dimension_numbers<[1], [0], [0], [1], [0, 0, 1, 1], [], []>} : vector<16x128xf32>, vector<128x32xf32>, vector<16x32xf32> -> vector<16x32xf32>
    %147 = vector.broadcast %9 : vector<1x32xf32> to vector<16x32xf32>
    %148 = arith.addf %146, %147 : vector<16x32xf32>
    %149 = arith.addf %111, %148 : vector<16x32xf32>
    %c0_58 = arith.constant 0 : index
    %c0_59 = arith.constant 0 : index
    %150 = vector.load %arg3[%c0_58, %c0_59] : memref<16x32xf32, #tpu.memory_space<vmem>>, vector<16x32xf32>
    tpu.vector_store %arg3[%c0_58, %c0_59], %149 {strides = array<i32>} : memref<16x32xf32, #tpu.memory_space<vmem>>, vector<16x32xf32>,
    return
  }
}

</mosaic_0001>

<bundles_post_ra>
// kernel: transformer_block.1
= control target key start
LH: loop header
LB: loop body
LE: loop exit
PB: predicated region body
PF: predicated region fallthrough
CT: control target
= control target key end

     0   :  { %vm31_vm0 = vcmask 261120   ;;  %s2122_s0 = inlined_call_operand.vmem [shape: f32[16,32], index: 0, kind: input, shape index: {}]   ;;  %s2123_s1 = inlined_call_operand.vmem [shape: f32[50,256], index: 1, kind: input, shape index: {}]   ;;  %s2124_s2 = inlined_call_operand.vmem [shape: f32[128,32], index: 2, kind: input, shape index: {}]   ;;  %s2125_s3 = inlined_call_operand.hbm [shape: f32[16,32], index: 3, kind: output, shape index: {}]  }
   0x1   :  { %v1832_v0 = vld [vmem:[%s2122_s0] sm:$0xff]  ;;  %v1837_v1 = vld [vmem:[%s2122_s0 + $0x8] sm:$0xff] }
   0x2   :  { %8 = vsyncpa [#allocation4], 0  ;;  %v32_v2 = vsel %vm31_vm0, %v1832_v0, 0.0  ;;  %v35_v3 = vsel %vm31_vm0, %v1837_v1, 0.0  ;;  %v1846_v4 = vld [vmem:[%s2123_s1 + $0x40] ss:$0 sm:$0xff] }
   0x3   :  { %33 = vadd.xlane.f32.xlu0 %v32_v2  ;;  %s1792_s18 = smov 96   ;;  %v1857_v15 = vld [vmem:[%s2123_s1] sm:$0xff]  ;;  %v1862_v16 = vld [vmem:[%s2123_s1 + $0x10] sm:$0xff]  ;;  %vm165_vm1 = vcmask 64512   ;;  %s1793_s26 = smov 120   ;;  %vm157_vm3 = vcmask 1045504  }
   0x4   :  { %v1714_v17 = vpack.i.bf16 %v1862_v16, %v1857_v15  ;;  %v1561_v18 = vpack.c.bf16 %v1862_v16, %v1857_v15  ;;  %v1871_v19 = vld [vmem:[%s2123_s1 + $0x20] sm:$0xff]  ;;  %v1876_v20 = vld [vmem:[%s2123_s1 + $0x30] sm:$0xff]  ;;  %s1794_s27 = smov 112   ;;  %s1795_s28 = smov 88   ;;  %vm1904_vm2 = vmpackc.low %vm165_vm1, %vm165_vm1  ;;  %vm249_vm4 = vcmask 130048   ;;  %vm569_vm5 = vcmask 130112  }
   0x5   :  { %v1565_v21 = vpack.c.bf16 %v1876_v20, %v1871_v19  ;;  %s1796_s29 = smov 80   ;;  %v27_v60 = vld [vmem:[%s2123_s1 + $0x50] sm:$0xff]  ;;  %v28_v61 = vld [vmem:[%s2123_s1 + $0x60] sm:$0x3]  ;;  %v26_v63 = vld [vmem:[%s2123_s1 + $0x40] sm:$0xfc] }
   0x6   :  { %1562 = vmatprep.subr.bf16.mxu1 %v1561_v18  ;;  %v159_v2 = vrot.slane %v27_v60, 2  ;;  %s1797_s9 = smov 72   ;;  %s1798_s10 = smov 104   ;;  %vm780_vm6 = vcmask 195712   ;;  %vm991_vm7 = vcmask 261312  }
   0x7   :  { %36 = vadd.xlane.f32.xlu0 %v35_v3  ;;  %1564 = vmatpush3.bf16.msra.mxu1 %v1561_v18  ;;  %v161_v3 = vrot.slane %v28_v61, 2  ;;  %s1799_s11 = smov 48   ;;  %s1800_s12 = smov 56  }
   0x8   :  { %1566 = vmatprep.subr.bf16.mxu1 %v1565_v21  ;;  %s1801_s13 = smov 40   ;;  %s1802_s14 = smov 64  }
   0x9   :  { %s1803_s15 = smov 8   ;;  %s1804_s16 = smov 24  }
   0xa   :  { %s1805_s17 = smov 16   ;;  %s1806_s0 = smov 32  }
   0xb   :  { %1568 = vmatpush3.bf16.msra.mxu1 %v1565_v21 }
  0x1d   :  { %62 = vrot.lane.b32.xlu0 %v1846_v4, %s1792_s18 }
  0x90   :  { %v34_v5 = vpop.xlane.xlu0 %33 }
  0x91   :  { %v39_v6 = vmul.f32 0.03125, %v34_v5  ;;  %v158_v5 = vrot.slane %v26_v63, 2 }
  0x93   :  { %v41_v7 = vsub.f32 %v1832_v0, %v39_v6  ;;  %v1935_v6 = vsel %vm157_vm3, %v159_v2, %v161_v3 }
  0x94   :  { %v37_v8 = vpop.xlane.xlu0 %36 }
  0x95   :  { %v40_v9 = vmul.f32 0.03125, %v37_v8  ;;  %v43_v10 = vmul.f32 %v41_v7, %v41_v7  ;;  %v1937_v8 = vsel %vm157_vm3, %v158_v5, %v159_v2 }
  0x97   :  { %v42_v11 = vsub.f32 %v1837_v1, %v40_v9  ;;  %v45_v12 = vsel %vm31_vm0, %v43_v10, 0.0 }
  0x98   :  { %46 = vadd.xlane.f32.xlu1 %v45_v12  ;;  %v63_v30 = vpop.permute.xlu0 %62 }
  0x99   :  { %v44_v13 = vmul.f32 %v42_v11, %v42_v11 }
  0x9b   :  { %v48_v14 = vsel %vm31_vm0, %v44_v13, 0.0 }
  0x9c   :  { %49 = vadd.xlane.f32.xlu1 %v48_v14 }
 0x125   :  { %v47_v22 = vpop.xlane.xlu1 %46 }
 0x126   :  { %v51_v23 = vmul.f32 0.03125, %v47_v22 }
 0x128   :  { %v53_v24 = vadd.f32 1e-05, %v51_v23 }
 0x129   :  { %v50_v25 = vpop.xlane.xlu1 %49 }
 0x12a   :  { %1724 = vrsqrt.f32 %v53_v24  ;;  %v52_v26 = vmul.f32 0.03125, %v50_v25 }
 0x12c   :  { %v54_v27 = vadd.f32 1e-05, %v52_v26 }
 0x12e   :  { %1726 = vrsqrt.f32 %v54_v27 }
 0x134   :  { %v1725_v28 = vpop.eup %1724 }
 0x135   :  { %v57_v29 = vmul.f32 %v1725_v28, %v41_v7 }
 0x137   :  { %v59_v31 = vmul.f32 %v57_v29, %v1846_v4 }
 0x138   :  { %v1727_v32 = vpop.eup %1726 }
 0x139   :  { %v58_v33 = vmul.f32 %v1727_v32, %v42_v11  ;;  %v65_v34 = vadd.f32 %v63_v30, %v59_v31 }
 0x13b   :  { %v60_v35 = vmul.f32 %v58_v33, %v1846_v4  ;;  %1445 = vmatprep.mubr.msk.f32.mxu1 %vm31_vm0, %v65_v34 }
 0x13d   :  { %v66_v36 = vadd.f32 %v63_v30, %v60_v35 }
 0x13f   :  { %1446 = vmatmul.mubr.msk.f32.vlgmr.msra.gmra.mrb[0].mxu1 %vm31_vm0, %v66_v36 }
 0x212   :  { %v1884_v37 = vpop.f32.mrb[0].mxu1 }
 0x213   :  { %v1886_v38 = vpop.f32.mrb[1].mxu1 }
 0x214   :  { %361 = vrot.lane.b32.xlu0 %v1886_v38, %s1793_s26  ;;  %1452 = vmatprep.mubr.msk.f32.mxu1 %vm165_vm1, %v1886_v38  ;;  %v1893_v39 = vpack.i.bf16 %v1884_v37, %v1886_v38 }
 0x216   :  { %1675 = vrot.lane.b32.xlu1 %v1893_v39, %s1792_s18 }
 0x218   :  { %572 = vrot.lane.b32.xlu0 %v1886_v38, %s1794_s27 }
 0x21a   :  { %1680 = vrot.lane.b32.xlu1 %v1893_v39, %s1795_s28 }
 0x21e   :  { %1685 = vrot.lane.b32.xlu1 %v1893_v39, %s1796_s29 }
 0x222   :  { %363 = vrot.lane.b32.xlu1 %v1884_v37, %s1793_s26 }
 0x226   :  { %574 = vrot.lane.b32.xlu1 %v1884_v37, %s1794_s27 }
 0x286   :  { %v362_v52 = vpop.permute.xlu0 %361 }
 0x288   :  { %v1676_v40 = vpop.permute.xlu1 %1675 }
 0x289   :  { %v1678_v41 = vunpack.i.h.bf16 %v1676_v40  ;;  %v1677_v42 = vunpack.i.l.bf16 %v1676_v40 }
 0x28a   :  { %v573_v55 = vpop.permute.xlu0 %572 }
 0x28b   :  { %v1569_v44 = vpack.c.bf16 %v1678_v41, %v1677_v42 }
 0x28c   :  { %v1681_v45 = vpop.permute.xlu1 %1680 }
 0x28d   :  { %v1683_v46 = vunpack.i.h.bf16 %v1681_v45  ;;  %v1682_v47 = vunpack.i.l.bf16 %v1681_v45  ;;  %1571 = vmatprep.subr.msk.bf16.mxu1 %vm1904_vm2, %v1569_v44 }
 0x28e   :  { %1574 = vmatpush3.bf16.xpose.msk.msra.mxu1 %vm1904_vm2, %v1569_v44 }
 0x28f   :  { %v1579_v48 = vpack.c.bf16 %v1683_v46, %v1682_v47 }
 0x290   :  { %v1686_v49 = vpop.permute.xlu1 %1685 }
 0x291   :  { %v1688_v50 = vunpack.i.h.bf16 %v1686_v49  ;;  %v1687_v51 = vunpack.i.l.bf16 %v1686_v49  ;;  %1581 = vmatprep.subr.msk.bf16.mxu1 %vm1904_vm2, %v1579_v48 }
 0x293   :  { %v1589_v53 = vpack.c.bf16 %v1688_v50, %v1687_v51 }
 0x294   :  { %v364_v54 = vpop.permute.xlu1 %363 }
 0x295   :  { %1453 = vmatmul.mubr.msk.f32.vlgmr.msra.gmra.mrb[2].mxu1 %vm165_vm1, %v1884_v37 }
 0x296   :  { %1584 = vmatpush3.bf16.xpose.msk.msra.mxu1 %vm1904_vm2, %v1579_v48  ;;  %1466 = vmatprep.mubr.msk.f32.mxu1 %vm165_vm1, %v362_v52 }
 0x297   :  { %1591 = vmatprep.subr.msk.bf16.mxu1 %vm1904_vm2, %v1589_v53 }
 0x298   :  { %v575_v56 = vpop.permute.xlu1 %574 }
 0x29d   :  { %1467 = vmatmul.mubr.msk.f32.vlgmr.msra.gmra.mrb[4].mxu1 %vm165_vm1, %v364_v54 }
 0x29e   :  { %1594 = vmatpush3.bf16.xpose.msk.msra.mxu1 %vm1904_vm2, %v1589_v53  ;;  %1480 = vmatprep.mubr.msk.f32.mxu1 %vm165_vm1, %v573_v55 }
 0x2a5   :  { %1481 = vmatmul.mubr.msk.f32.vlgmr.msra.gmra.mrb[6].mxu1 %vm165_vm1, %v575_v56 }
 0x368   :  { %v1454_v57 = vpop.f32.mrb[2].mxu1 }
 0x369   :  { %v240_v58 = vpop.f32.mrb[3].mxu1  ;;  %v1948_v14 = vadd.f32 %v1454_v57, %v1935_v6 }
 0x36a   :  { %v241_v18 = vadd.f32 %v240_v58, %v1937_v8 }
 0x36b   :  { %v253_v21 = vsel %vm249_vm4, %v1948_v14, -inf }
 0x36c   :  { %v250_v23 = vsel %vm249_vm4, %v241_v18, -inf }
 0x370   :  { %v1468_v59 = vpop.f32.mrb[4].mxu1 }
 0x371   :  { %v443_v62 = vpop.f32.mrb[5].mxu1  ;;  %v449_v24 = vadd.f32 %v1468_v59, %v1935_v6 }
 0x372   :  { %v1954_v22 = vadd.f32 %v443_v62, %v1937_v8 }
 0x373   :  { %v455_v26 = vsel %vm249_vm4, %v449_v24, -inf }
 0x374   :  { %v452_v25 = vsel %vm249_vm4, %v1954_v22, -inf }
 0x378   :  { %v1482_v7 = vpop.f32.mrb[6].mxu1 }
 0x379   :  { %v660_v9 = vadd.f32 %v1482_v7, %v1935_v6  ;;  %v654_v10 = vpop.f32.mrb[7].mxu1 }
 0x37a   :  { %v655_v11 = vadd.f32 %v654_v10, %v1937_v8 }
 0x37b   :  { %v666_v12 = vsel %vm249_vm4, %v660_v9, -inf }
 0x37c   :  { %667 = vmax.xlane.f32.xlu1 %v666_v12  ;;  %v663_v13 = vsel %vm249_vm4, %v655_v11, -inf }
 0x37d   :  { %664 = vmax.xlane.f32.xlu0 %v663_v13 }
 0x38d   :  { %1695 = vrot.lane.b32.xlu1 %v1893_v39, %s1797_s9 }
 0x391   :  { %785 = vrot.lane.b32.xlu1 %v1884_v37, %s1798_s10 }
 0x393   :  { %1690 = vrot.lane.b32.xlu0 %v1893_v39, %s1799_s11 }
 0x397   :  { %783 = vrot.lane.b32.xlu0 %v1886_v38, %s1798_s10 }
 0x3b5   :  { %254 = vmax.xlane.f32.xlu1 %v253_v21 }
 0x3b6   :  { %251 = vmax.xlane.f32.xlu0 %v250_v23 }
 0x3ba   :  { %453 = vmax.xlane.f32.xlu0 %v452_v25 }
 0x3be   :  { %456 = vmax.xlane.f32.xlu0 %v455_v26 }
 0x409   :  { %v668_v27 = vpop.xlane.xlu1 %667 }
 0x40a   :  { %v670_v28 = vsub.f32 %v660_v9, %v668_v27  ;;  %v665_v29 = vpop.xlane.xlu0 %664 }
 0x40b   :  { %v669_v30 = vsub.f32 %v655_v11, %v665_v29 }
 0x40c   :  { %v673_v31 = vmul.f32 1.442695, %v670_v28 }
 0x40d   :  { %v671_v32 = vmul.f32 1.442695, %v669_v30  ;;  %v1696_v33 = vpop.permute.xlu1 %1695 }
 0x40e   :  { %v1698_v34 = vunpack.i.h.bf16 %v1696_v33  ;;  %v1691_v35 = vpop.permute.xlu0 %1690  ;;  %v1697_v36 = vunpack.i.l.bf16 %v1696_v33 }
 0x40f   :  { %1728 = vpow2.f32 %v671_v32  ;;  %v1693_v37 = vunpack.i.h.bf16 %v1691_v35  ;;  %v1692_v38 = vunpack.i.l.bf16 %v1691_v35 }
 0x410   :  { %1730 = vpow2.f32 %v673_v31  ;;  %v1599_v41 = vpack.c.bf16 %v1698_v34, %v1697_v36 }
 0x411   :  { %v1595_v40 = vpack.c.bf16 %v1693_v37, %v1692_v38  ;;  %v786_v46 = vpop.permute.xlu1 %785 }
 0x412   :  { %v784_v45 = vpop.permute.xlu0 %783 }
 0x413   :  { %1596 = vmatprep.subr.bf16.mxu1 %v1595_v40 }
 0x414   :  { %1598 = vmatpush3.bf16.msra.mxu1 %v1595_v40 }
 0x415   :  { %1601 = vmatprep.subr.msk.bf16.mxu1 %vm1904_vm2, %v1599_v41 }
 0x419   :  { %v1729_v42 = vpop.eup %1728 }
 0x41a   :  { %v1731_v44 = vpop.eup %1730  ;;  %1487 = vmatprep.mubr.msk.f32.mxu1 %vm249_vm4, %v1729_v42  ;;  %v675_v7 = vsel %vm249_vm4, %v1729_v42, 0.0 }
 0x41b   :  { %1488 = vmatmul.mubr.msk.f32.vlgmr.msra.gmra.mrb[8].mxu1 %vm249_vm4, %v1731_v44 }
 0x41c   :  { %1494 = vmatprep.mubr.msk.f32.mxu1 %vm165_vm1, %v784_v45 }
 0x41d   :  { %1604 = vmatpush3.bf16.xpose.msk.msra.mxu1 %vm1904_vm2, %v1599_v41 }
 0x424   :  { %1495 = vmatmul.mubr.msk.f32.vlgmr.msra.gmra.mrb[10].mxu1 %vm165_vm1, %v786_v46 }
 0x443   :  { %v252_v47 = vpop.xlane.xlu0 %251 }
 0x444   :  { %v256_v48 = vsub.f32 %v241_v18, %v252_v47 }
 0x446   :  { %v258_v49 = vmul.f32 1.442695, %v256_v48 }
 0x447   :  { %v454_v58 = vpop.xlane.xlu0 %453 }
 0x448   :  { %1732 = vpow2.f32 %v258_v49  ;;  %v458_v61 = vsub.f32 %v1954_v22, %v454_v58 }
 0x44a   :  { %v460_v63 = vmul.f32 1.442695, %v458_v61 }
 0x44b   :  { %v457_v59 = vpop.xlane.xlu0 %456 }
 0x44c   :  { %v459_v60 = vsub.f32 %v449_v24, %v457_v59 }
 0x44e   :  { %v462_v62 = vmul.f32 1.442695, %v459_v60 }
 0x450   :  { %1734 = vpow2.f32 %v462_v62 }
 0x451   :  { %1736 = vpow2.f32 %v460_v63 }
 0x452   :  { %v1969_v50 = vpop.eup %1732 }
 0x453   :  { %1459 = vmatprep.mubr.msk.f32.mxu0 %vm249_vm4, %v1969_v50  ;;  %v262_v41 = vsel %vm249_vm4, %v1969_v50, 0.0 }
 0x45a   :  { %v1735_v2 = vpop.eup %1734 }
 0x45b   :  { %v1737_v3 = vpop.eup %1736  ;;  %v467_v5 = vsel %vm249_vm4, %v1735_v2, 0.0 }
 0x4ee   :  { %v1973_v51 = vpop.f32.mrb[8].mxu1 }
 0x4ef   :  { %v1975_v52 = vpop.f32.mrb[9].mxu1 }
 0x4f7   :  { %v1496_v53 = vpop.f32.mrb[10].mxu1 }
 0x4f8   :  { %v871_v43 = vadd.f32 %v1496_v53, %v1935_v6  ;;  %v865_v54 = vpop.f32.mrb[11].mxu1  ;;  %v464_v6 = vsel %vm249_vm4, %v1737_v3, 0.0 }
 0x4f9   :  { %v866_v55 = vadd.f32 %v865_v54, %v1937_v8  ;;  %v255_v8 = vpop.xlane.xlu1 %254 }
 0x4fa   :  { %v877_v56 = vsel %vm249_vm4, %v871_v43, -inf  ;;  %v257_v9 = vsub.f32 %v1948_v14, %v255_v8  ;;  %v1719_v8 = vpack.i.bf16 %v1876_v20, %v1871_v19 }
 0x4fb   :  { %878 = vmax.xlane.f32.xlu1 %v877_v56  ;;  %v874_v57 = vsel %vm249_vm4, %v866_v55, -inf }
 0x4fc   :  { %875 = vmax.xlane.f32.xlu0 %v874_v57  ;;  %v260_v10 = vmul.f32 1.442695, %v257_v9 }
 0x4fe   :  { %1738 = vpow2.f32 %v260_v10 }
 0x508   :  { %v1739_v33 = vpop.eup %1738 }
 0x509   :  { %v265_v40 = vsel %vm249_vm4, %v1739_v33, 0.0 }
 0x50c   :  { %1705 = vrot.lane.b32.xlu1 %v1893_v39, %s1800_s12 }
 0x510   :  { %1710 = vrot.lane.b32.xlu1 %v1893_v39, %s1801_s13 }
 0x512   :  { %1700 = vrot.lane.b32.xlu0 %v1893_v39, %s1802_s14  ;;  %v678_v39 = vsel %vm249_vm4, %v1731_v44, 0.0 }
 0x531   :  { %468 = vadd.xlane.f32.xlu0 %v467_v5 }
 0x534   :  { %465 = vadd.xlane.f32.xlu1 %v464_v6 }
 0x535   :  { %676 = vadd.xlane.f32.xlu0 %v675_v7 }
 0x539   :  { %679 = vadd.xlane.f32.xlu0 %v678_v39 }
 0x588   :  { %v879_v11 = vpop.xlane.xlu1 %878 }
 0x589   :  { %v881_v12 = vsub.f32 %v871_v43, %v879_v11  ;;  %v876_v13 = vpop.xlane.xlu0 %875 }
 0x58a   :  { %v880_v18 = vsub.f32 %v866_v55, %v876_v13 }
 0x58b   :  { %v884_v21 = vmul.f32 1.442695, %v881_v12 }
 0x58c   :  { %v882_v22 = vmul.f32 1.442695, %v880_v18  ;;  %v1706_v23 = vpop.permute.xlu1 %1705 }
 0x58d   :  { %1740 = vpow2.f32 %v884_v21  ;;  %v1708_v24 = vunpack.i.h.bf16 %v1706_v23  ;;  %v1701_v25 = vpop.permute.xlu0 %1700  ;;  %v1707_v26 = vunpack.i.l.bf16 %v1706_v23 }
 0x58e   :  { %1742 = vpow2.f32 %v882_v22  ;;  %v1703_v27 = vunpack.i.h.bf16 %v1701_v25  ;;  %v1702_v28 = vunpack.i.l.bf16 %v1701_v25 }
 0x58f   :  { %v1585_v31 = vpack.c.bf16 %v1708_v24, %v1707_v26 }
 0x590   :  { %v1711_v29 = vpop.permute.xlu1 %1710  ;;  %v1575_v30 = vpack.c.bf16 %v1703_v27, %v1702_v28  ;;  %v25_v28 = vld [vmem:[%s2123_s1 + $0x41] ss:$0 sm:$0xff] }
 0x591   :  { %v1713_v14 = vunpack.i.h.bf16 %v1711_v29  ;;  %v1712_v32 = vunpack.i.l.bf16 %v1711_v29 }
 0x592   :  { %1576 = vmatprep.subr.bf16.mxu0 %v1575_v30 }
 0x593   :  { %1578 = vmatpush3.bf16.msra.mxu0 %v1575_v30  ;;  %v1605_v34 = vpack.c.bf16 %v1713_v14, %v1712_v32 }
 0x594   :  { %1586 = vmatprep.subr.bf16.mxu0 %v1585_v31 }
 0x596   :  { %1460 = vmatmul.mubr.msk.f32.vlgmr.msra.gmra.mrb[0].mxu0 %vm249_vm4, %v1739_v33 }
 0x597   :  { %v1741_v35 = vpop.eup %1740  ;;  %1588 = vmatpush3.bf16.msra.mxu0 %v1585_v31  ;;  %1473 = vmatprep.mubr.msk.f32.mxu0 %vm249_vm4, %v1737_v3 }
 0x598   :  { %v1743_v36 = vpop.eup %1742  ;;  %1606 = vmatprep.subr.bf16.mxu0 %v1605_v34  ;;  %v889_v37 = vsel %vm249_vm4, %v1741_v35, 0.0 }
 0x599   :  { %890 = vadd.xlane.f32.xlu0 %v889_v37  ;;  %v886_v38 = vsel %vm249_vm4, %v1743_v36, 0.0 }
 0x59a   :  { %887 = vadd.xlane.f32.xlu1 %v886_v38  ;;  %1474 = vmatmul.mubr.msk.f32.vlgmr.msra.gmra.mrb[2].mxu0 %vm249_vm4, %v1735_v2 }
 0x59b   :  { %1608 = vmatpush3.bf16.msra.mxu0 %v1605_v34  ;;  %1501 = vmatprep.mubr.msk.f32.mxu0 %vm249_vm4, %v1743_v36 }
 0x59d   :  { %266 = vadd.xlane.f32.xlu0 %v265_v40 }
 0x59e   :  { %263 = vadd.xlane.f32.xlu1 %v262_v41  ;;  %1502 = vmatmul.mubr.msk.f32.vlgmr.msra.gmra.mrb[4].mxu0 %vm249_vm4, %v1741_v35 }
 0x5be   :  { %v469_v42 = vpop.xlane.xlu0 %468 }
 0x5c1   :  { %v466_v46 = vpop.xlane.xlu1 %465 }
 0x5c2   :  { %v677_v44 = vpop.xlane.xlu0 %676 }
 0x5c6   :  { %v680_v45 = vpop.xlane.xlu0 %679 }
 0x626   :  { %v891_v47 = vpop.xlane.xlu0 %890 }
 0x627   :  { %v888_v48 = vpop.xlane.xlu1 %887 }
 0x62a   :  { %v267_v49 = vpop.xlane.xlu0 %266 }
 0x62b   :  { %v264_v53 = vpop.xlane.xlu1 %263  ;;  %1744 = vrcp.f32 %v267_v49  ;;  %v21_v49 = vld [vmem:[%s2123_s1 + $0x28] sm:$0xff] }
 0x62c   :  { %1746 = vrcp.f32 %v264_v53  ;;  %v22_v53 = vld [vmem:[%s2123_s1 + $0x38] sm:$0xff] }
 0x62d   :  { %1748 = vrcp.f32 %v469_v42 }
 0x62e   :  { %1750 = vrcp.f32 %v466_v46  ;;  %v19_v46 = vld [vmem:[%s2123_s1 + $0x8] sm:$0xff] }
 0x62f   :  { %1752 = vrcp.f32 %v677_v44 }
 0x630   :  { %1754 = vrcp.f32 %v888_v48 }
 0x631   :  { %1756 = vrcp.f32 %v680_v45 }
 0x632   :  { %1758 = vrcp.f32 %v891_v47  ;;  %v20_v47 = vld [vmem:[%s2123_s1 + $0x18] sm:$0xff] }
 0x633   :  { %v1617_v48 = vpack.c.bf16 %v20_v47, %v19_v46 }
 0x635   :  { %v1745_v43 = vpop.eup %1744  ;;  %1618 = vmatprep.subr.bf16.mxu1 %v1617_v48 }
 0x636   :  { %v1747_v50 = vpop.eup %1746  ;;  %1620 = vmatpush3.bf16.msra.mxu1 %v1617_v48 }
 0x637   :  { %v1749_v58 = vpop.eup %1748 }
 0x638   :  { %v1751_v60 = vpop.eup %1750 }
 0x639   :  { %v1753_v2 = vpop.eup %1752 }
 0x63a   :  { %v1755_v5 = vpop.eup %1754  ;;  %v770_v39 = vmul.f32 %v1753_v2, %v1975_v52 }
 0x63b   :  { %v1757_v9 = vpop.eup %1756 }
 0x63c   :  { %v771_v10 = vmul.f32 %v1757_v9, %v1973_v51  ;;  %v1759_v52 = vpop.eup %1758 }
 0x669   :  { %v1461_v54 = vpop.f32.mrb[0].mxu0 }
 0x66a   :  { %v358_v55 = vmul.f32 %v1745_v43, %v1461_v54  ;;  %v346_v56 = vpop.f32.mrb[1].mxu0  ;;  %v1224_v43 = vld [vmem:[%s2124_s2] sm:$0xff]  ;;  %v1225_v54 = vld [vmem:[%s2124_s2 + $0x8] sm:$0xff] }
 0x66b   :  { %v357_v57 = vmul.f32 %v1747_v50, %v346_v56  ;;  %v1226_v50 = vld [vmem:[%s2124_s2 + $0x10] sm:$0xff]  ;;  %v1227_v56 = vld [vmem:[%s2124_s2 + $0x18] sm:$0xff] }
 0x66c   :  { %360 = vst.msk [vmem:[#allocation2 + $0x8] sm:$0xff] %vm165_vm1, %v358_v55  ;;  %v1625_v55 = vpack.c.bf16 %v1225_v54, %v1224_v43 }
 0x66d   :  { %359 = vst.msk [vmem:[#allocation2] sm:$0xff] %vm165_vm1, %v357_v57  ;;  %v1475_v59 = vpop.f32.mrb[2].mxu0  ;;  %v1629_v57 = vpack.c.bf16 %v1227_v56, %v1226_v50 }
 0x66e   :  { %v560_v61 = vmul.f32 %v1749_v58, %v1475_v59  ;;  %v548_v62 = vpop.f32.mrb[3].mxu0  ;;  %v1228_v58 = vld [vmem:[%s2124_s2 + $0x20] sm:$0xff]  ;;  %v1229_v59 = vld [vmem:[%s2124_s2 + $0x28] sm:$0xff] }
 0x66f   :  { %v559_v63 = vmul.f32 %v1751_v60, %v548_v62  ;;  %v1633_v60 = vpack.c.bf16 %v1229_v59, %v1228_v58 }
 0x670   :  { %565 = vrot.lane.b32.xlu0 %v560_v61, %s1803_s15 }
 0x671   :  { %v1503_v3 = vpop.f32.mrb[4].mxu0  ;;  %563 = vrot.lane.b32.xlu1 %v559_v63, %s1803_s15 }
 0x672   :  { %v970_v6 = vpop.f32.mrb[5].mxu0  ;;  %v982_v11 = vmul.f32 %v1759_v52, %v1503_v3 }
 0x673   :  { %v981_v7 = vmul.f32 %v1755_v5, %v970_v6 }
 0x675   :  { %985 = vrot.lane.b32.xlu0 %v981_v7, %s1804_s16  ;;  %774 = vrot.lane.b32.xlu1 %v770_v39, %s1805_s17 }
 0x679   :  { %1715 = vrot.lane.b32.xlu1 %v1714_v17, %s1806_s0  ;;  %1720 = vrot.lane.b32.xlu0 %v1719_v8, %s1806_s0 }
 0x67d   :  { %776 = vrot.lane.b32.xlu1 %v771_v10, %s1805_s17 }
 0x681   :  { %987 = vrot.lane.b32.xlu1 %v982_v11, %s1804_s16 }
 0x6e2   :  { %v566_v12 = vpop.permute.xlu0 %565 }
 0x6e3   :  { %571 = vst.msk [vmem:[#allocation2 + $0x8] sm:$0xff] %vm569_vm5, %v566_v12  ;;  %v564_v13 = vpop.permute.xlu1 %563 }
 0x6e4   :  { %570 = vst.msk [vmem:[#allocation2] sm:$0xff] %vm569_vm5, %v564_v13 }
 0x6e7   :  { %v986_v19 = vpop.permute.xlu0 %985  ;;  %v775_v20 = vpop.permute.xlu1 %774 }
 0x6e8   :  { %781 = vst.msk [vmem:[#allocation2] sm:$0xff] %vm780_vm6, %v775_v20  ;;  %v1231_v20 = vld [vmem:[%s2124_s2 + $0x38] sm:$0xff] }
 0x6e9   :  { %992 = vst.msk [vmem:[#allocation2] sm:$0xff] %vm991_vm7, %v986_v19  ;;  %v1230_v19 = vld [vmem:[%s2124_s2 + $0x30] sm:$0xff] }
 0x6eb   :  { %v1716_v15 = vpop.permute.xlu1 %1715  ;;  %v1721_v16 = vpop.permute.xlu0 %1720 }
 0x6ec   :  { %v1718_v17 = vunpack.i.h.bf16 %v1716_v15  ;;  %v1717_v51 = vunpack.i.l.bf16 %v1716_v15  ;;  %v1723_v18 = vunpack.i.h.bf16 %v1721_v16  ;;  %v1722_v21 = vunpack.i.l.bf16 %v1721_v16  ;;  %v1232_v16 = vld [vmem:[%s2124_s2 + $0x40] sm:$0xff] }
 0x6ed   :  { %v1637_v15 = vpack.c.bf16 %v1231_v20, %v1230_v19 }
 0x6ee   :  { %v1609_v22 = vpack.c.bf16 %v1718_v17, %v1717_v51  ;;  %v1613_v23 = vpack.c.bf16 %v1723_v18, %v1722_v21  ;;  %v1233_v17 = vld [vmem:[%s2124_s2 + $0x48] sm:$0xff]  ;;  %v1234_v18 = vld [vmem:[%s2124_s2 + $0x50] sm:$0xff]  ;;  %v1235_v21 = vld [vmem:[%s2124_s2 + $0x58] sm:$0xff] }
 0x6ef   :  { %v777_v24 = vpop.permute.xlu1 %776  ;;  %v1641_v51 = vpack.c.bf16 %v1233_v17, %v1232_v16 }
 0x6f0   :  { %782 = vst.msk [vmem:[#allocation2 + $0x8] sm:$0xff] %vm780_vm6, %v777_v24  ;;  %1610 = vmatprep.subr.bf16.mxu0 %v1609_v22  ;;  %v994_v25 = vld [vmem:[#allocation2] sm:$0xff]  ;;  %v1237_v24 = vld [vmem:[%s2124_s2 + $0x68] sm:$0xff] }
 0x6f1   :  { %1612 = vmatpush3.bf16.msra.mxu0 %v1609_v22  ;;  %1512 = vmatprep.mubr.msk.f32.mxu0 %vm31_vm0, %v994_v25  ;;  %v1645_v22 = vpack.c.bf16 %v1235_v21, %v1234_v18 }
 0x6f2   :  { %1614 = vmatprep.subr.bf16.mxu0 %v1613_v23 }
 0x6f3   :  { %v988_v26 = vpop.permute.xlu1 %987 }
 0x6f4   :  { %993 = vst.msk [vmem:[#allocation2 + $0x8] sm:$0xff] %vm991_vm7, %v988_v26  ;;  %v1238_v26 = vld [vmem:[%s2124_s2 + $0x70] sm:$0xff] }
 0x6f5   :  { %1616 = vmatpush3.bf16.msra.mxu0 %v1613_v23  ;;  %v1236_v23 = vld [vmem:[%s2124_s2 + $0x60] sm:$0xff] }
 0x6f6   :  { %1626 = vmatprep.subr.bf16.mxu0 %v1625_v55  ;;  %v1649_v25 = vpack.c.bf16 %v1237_v24, %v1236_v23 }
 0x6fb   :  { %v995_v27 = vld [vmem:[#allocation2 + $0x8] sm:$0xff] }
 0x6fc   :  { %1513 = vmatmul.mubr.msk.f32.vlgmr.msra.gmra.mrb[6].mxu0 %vm31_vm0, %v995_v27  ;;  %v1239_v27 = vld [vmem:[%s2124_s2 + $0x78] sm:$0xff] }
 0x6fd   :  { %1628 = vmatpush3.bf16.msra.mxu0 %v1625_v55 }
 0x6fe   :  { %1630 = vmatprep.subr.bf16.mxu0 %v1629_v57 }
 0x701   :  { %1632 = vmatpush3.bf16.msra.mxu0 %v1629_v57 }
 0x702   :  { %1634 = vmatprep.subr.bf16.mxu0 %v1633_v60 }
 0x705   :  { %1636 = vmatpush3.bf16.msra.mxu0 %v1633_v60 }
 0x706   :  { %1638 = vmatprep.subr.bf16.mxu0 %v1637_v15 }
 0x709   :  { %1640 = vmatpush3.bf16.msra.mxu0 %v1637_v15 }
 0x70a   :  { %1642 = vmatprep.subr.bf16.mxu0 %v1641_v51 }
 0x70d   :  { %1644 = vmatpush3.bf16.msra.mxu0 %v1641_v51 }
 0x70e   :  { %1646 = vmatprep.subr.bf16.mxu0 %v1645_v22 }
 0x711   :  { %1648 = vmatpush3.bf16.msra.mxu0 %v1645_v22 }
 0x712   :  { %1650 = vmatprep.subr.bf16.mxu0 %v1649_v25 }
 0x715   :  { %1652 = vmatpush3.bf16.msra.mxu0 %v1649_v25 }
 0x7cf   :  { %v1514_v29 = vpop.f32.mrb[6].mxu0 }
 0x7d0   :  { %v1094_v30 = vadd.f32 %v1514_v29, %v1837_v1  ;;  %v1084_v31 = vpop.f32.mrb[7].mxu0  ;;  %v24_v29 = vld [vmem:[%s2123_s1 + $0x48] ss:$0 sm:$0xff]  ;;  %s1807_s1 = smov [#allocation3]  }
 0x7d1   :  { %v1093_v14 = vadd.f32 %v1084_v31, %v1832_v0  ;;  %s1328_s2 = sshll.u32 %s1807_s1, 4  ;;  %s1329_s2 = int_to_ptr.vmem [resolvable:$true] %s1328_s2 }
 0x7d2   :  { %v2023_v32 = vadd.f32 %v1094_v30, %v25_v28  ;;  %s1768_s8 = scalar_lea.vmem %s1329_s2, 256  ;;  %p1773_p1 = scmp.lt.s32.totalorder %s1329_s2, %s1329_s2 }
 0x7d3   :  { %v2025_v33 = vadd.f32 %v1093_v14, %v25_v28  ;;  %p1769_p0 = scmp.ne.s32.totalorder %s1329_s2, %s1768_s8  ;;  %p1774_p2 = scmp.lt.s32.totalorder %s1768_s8, %s1768_s8 }
 0x7d4   :  { %v1100_v34 = vsel %vm31_vm0, %v2023_v32, 0.0 }
 0x7d5   :  { %1101 = vadd.xlane.f32.xlu0 %v1100_v34  ;;  %v1097_v35 = vsel %vm31_vm0, %v2025_v33, 0.0  ;;  %p1775_p3 = por %p1774_p2, %p1773_p1 }
 0x7d6   :  { %1098 = vadd.xlane.f32.xlu1 %v1097_v35 }
 0x7d7   :  { %p1776_p4 = pnand %p1775_p3, %p1769_p0 }
 0x7e7   :  { %1123 = vrot.lane.b32.xlu1 %v1846_v4, %s1802_s14 }
 0x7eb   :  { %1241 = vrot.lane.b32.xlu1 %v25_v28, %s1792_s18  ;;  %v1653_v28 = vpack.c.bf16 %v1239_v27, %v1238_v26 }
 0x7ed   :  { %1654 = vmatprep.subr.bf16.mxu0 %v1653_v28 }
 0x7ee   :  { %1656 = vmatpush3.bf16.msra.mxu0 %v1653_v28 }
 0x862   :  { %v1102_v1 = vpop.xlane.xlu0 %1101 }
 0x863   :  { %v1104_v36 = vmul.f32 0.03125, %v1102_v1  ;;  %v1099_v0 = vpop.xlane.xlu1 %1098 }
 0x864   :  { %v1103_v37 = vmul.f32 0.03125, %v1099_v0 }
 0x865   :  { %v1106_v38 = vsub.f32 %v2023_v32, %v1104_v36 }
 0x866   :  { %v1105_v40 = vsub.f32 %v2025_v33, %v1103_v37 }
 0x867   :  { %v1108_v44 = vmul.f32 %v1106_v38, %v1106_v38  ;;  %v1124_v7 = vpop.permute.xlu1 %1123 }
 0x868   :  { %v1107_v41 = vmul.f32 %v1105_v40, %v1105_v40 }
 0x869   :  { %v1112_v45 = vsel %vm31_vm0, %v1108_v44, 0.0 }
 0x86a   :  { %v1109_v42 = vsel %vm31_vm0, %v1107_v41, 0.0 }
 0x86b   :  { %1110 = vadd.xlane.f32.xlu0 %v1109_v42 }
 0x86f   :  { %1113 = vadd.xlane.f32.xlu0 %v1112_v45  ;;  %v1242_v45 = vpop.permute.xlu1 %1241 }
 0x885   :  { %1128 = vrot.lane.b32.xlu0 %v1846_v4, %s1806_s0  ;;  %v1621_v4 = vpack.c.bf16 %v22_v53, %v21_v49 }
 0x887   :  { %1622 = vmatprep.subr.bf16.mxu1 %v1621_v4 }
 0x888   :  { %1624 = vmatpush3.bf16.msra.mxu1 %v1621_v4 }
 0x8f8   :  { %v1111_v61 = vpop.xlane.xlu0 %1110 }
 0x8f9   :  { %v1115_v62 = vmul.f32 0.03125, %v1111_v61 }
 0x8fb   :  { %v1117_v63 = vadd.f32 1e-05, %v1115_v62 }
 0x8fc   :  { %v1114_v2 = vpop.xlane.xlu0 %1113 }
 0x8fd   :  { %1760 = vrsqrt.f32 %v1117_v63  ;;  %v1116_v3 = vmul.f32 0.03125, %v1114_v2 }
 0x8ff   :  { %v1118_v5 = vadd.f32 1e-05, %v1116_v3 }
 0x900   :  { %v1129_v8 = vpop.permute.xlu0 %1128 }
 0x901   :  { %1762 = vrsqrt.f32 %v1118_v5 }
 0x907   :  { %v1761_v6 = vpop.eup %1760 }
 0x908   :  { %v1121_v39 = vmul.f32 %v1761_v6, %v1105_v40 }
 0x90a   :  { %v1126_v9 = vmul.f32 %v1124_v7, %v1121_v39 }
 0x90b   :  { %v1763_v10 = vpop.eup %1762 }
 0x90c   :  { %v1122_v52 = vmul.f32 %v1763_v10, %v1106_v38  ;;  %v1131_v11 = vadd.f32 %v1129_v8, %v1126_v9 }
 0x90e   :  { %v1127_v12 = vmul.f32 %v1124_v7, %v1122_v52  ;;  %1523 = vmatprep.mubr.msk.f32.mxu1 %vm31_vm0, %v1131_v11 }
 0x910   :  { %v1132_v13 = vadd.f32 %v1129_v8, %v1127_v12 }
 0x912   :  { %1524 = vmatmul.mubr.msk.f32.vlgmr.msra.gmra.mrb[12].mxu1 %vm31_vm0, %v1132_v13 }
 0x9e5   :  { %v1525_v30 = vpop.f32.mrb[12].mxu1 }
 0x9e6   :  { %v1211_v31 = vadd.f32 %v1525_v30, %v24_v29  ;;  %v1205_v14 = vpop.f32.mrb[13].mxu1 }
 0x9e7   :  { %v1206_v34 = vadd.f32 %v1205_v14, %v24_v29 }
 0x9e8   :  { %v1217_v35 = vmul.f32 0.70710677, %v1211_v31  ;;  %v1215_v41 = vmul.f32 0.5, %v1211_v31 }
 0x9e9   :  { %v1216_v1 = vmul.f32 0.70710677, %v1206_v34  ;;  %v1214_v38 = vmul.f32 0.5, %v1206_v34 }
 0x9ea   :  { %1764 = verf.f32 %v1217_v35 }
 0x9eb   :  { %1766 = verf.f32 %v1216_v1 }
 0x9f4   :  { %v1765_v36 = vpop.eup %1764 }
 0x9f5   :  { %v1767_v0 = vpop.eup %1766  ;;  %v1221_v37 = vadd.f32 1.0, %v1765_v36 }
 0x9f6   :  { %v1220_v40 = vadd.f32 1.0, %v1767_v0 }
 0x9f7   :  { %v1223_v44 = vmul.f32 %v1221_v37, %v1215_v41 }
 0x9f8   :  { %v1222_v42 = vmul.f32 %v1220_v40, %v1214_v38 }
 0x9fa   :  { %1558 = vmatprep.mubr.f32.mxu0 %v1222_v42 }
 0x9fb   :  { %1559 = vmatmul.mubr.f32.vlgmr.msra.gmra.mrb[8].mxu0 %v1223_v44 }
 0xace   :  { %v1560_v46 = vpop.f32.mrb[8].mxu0 }
 0xacf   :  { %v1316_v47 = vadd.f32 %v1560_v46, %v1242_v45  ;;  %v1310_v48 = vpop.f32.mrb[9].mxu0 }
 0xad0   :  { %v1311_v49 = vadd.f32 %v1310_v48, %v1242_v45 }
 0xad1   :  { %v1320_v53 = vadd.f32 %v1316_v47, %v2023_v32 }
 0xad2   :  { %v1319_v4 = vadd.f32 %v1311_v49, %v2025_v33 }
 0xad3   :  { %1322 = vst.msk [vmem:[#allocation3 + $0x8] sm:$0xff] %vm31_vm0, %v1320_v53 }
 0xad4   :  { %1321 = vst.msk [vmem:[#allocation3] sm:$0xff] %vm31_vm0, %v1319_v4 }
 0xad5   :  { %1779 = shalt.err (!%p1776_p4)
}
 0xad6   :  { %s1780_s11 = scalar_lea.hbm %s2125_s3, 256 }
 0xad7   :  { %p1781_p5 = scmp.ne.s32.totalorder %s2125_s3, %s1780_s11  ;;  %p1784_p6 = scmp.lt.u32.totalorder %s1780_s11, %s2125_s3 }
 0xad9   :  { %p1786_p7 = pnand %p1784_p6, %p1781_p5 }
 0xadb   :  { %1789 = shalt.err (!%p1786_p7)
}
 0xadc   :  { %s1808_s17 = smov 128  }
 0xadd   :  { %1334 = dma.vmem_to_hbm [thread:$0]  %s1329_s2, 256, %s2125_s3, [#allocation4], %s1808_s17, %s1808_s17, %s1803_s15  }
 0xade   :  { %1790 = dma.done.wait [#allocation4], 256  }
 0xadf   :  { %1791 = vsyncadd [#allocation4], 4294967040 }
 0xae0   :  { %1338 = vsyncpa [#allocation4], 1 }

</bundles_post_ra>
